<compile_context>
chip_gen: v7x
topology: tpu7x:2x2x1
jax: 0.10.0
libtpu: 0.0.40
codegen_flags: <defaults>
</compile_context>

<pallas_src>
import functools

import jax
import jax.numpy as jnp
import numpy as np
from jax.experimental import pallas as pl
from jax.experimental.pallas import tpu as pltpu


# ----------------------------------------------------------------------------
# Kernel
# ----------------------------------------------------------------------------
def _cvae_kernel(num_layers, latent, *refs):
    """refs layout (all VMEM blocks):
       inputs : xc  [tm, input_size] f32
                eps [tm, latent]     f32
                (w_i [in,out] bf16, b_i [1,out] f32) for encoder layers 0..L-1
                w_heads [h_last, 2*latent] bf16, b_heads [1, 2*latent] f32
       output : slab [tm, 4*latent] f32 laid out as [mean | logv | std | z]
    """
    xc = refs[0][...]
    eps = refs[1][...]
    idx = 2

    wdt = refs[2].dtype  # bf16 weight dtype

    # Encoder stack: Linear -> ReLU, activations kept bf16 between layers
    # (f32 accumulation inside the MXU via preferred_element_type).
    h = xc.astype(wdt)
    for _ in range(num_layers):
        w = refs[idx][...]
        b = refs[idx + 1][...]
        idx += 2
        a = jnp.dot(h, w, preferred_element_type=jnp.float32)
        h = jnp.maximum(a + b, 0.0).astype(wdt)

    # Fused mean/logv head: one [h, 2*latent] matmul, then static lane-aligned
    # 128-wide slices (wrapper asserts latent % 128 == 0).
    w_hd = refs[idx][...]
    b_hd = refs[idx + 1][...]
    out_ref = refs[idx + 2]

    heads = jnp.dot(h, w_hd, preferred_element_type=jnp.float32) + b_hd
    mean = heads[:, :latent]
    logv = heads[:, latent:]

    std = jnp.exp(0.5 * logv)          # EUP slot; co-issues under MXU/DMA
    z = eps * std + mean               # reparameterized sample

    # Single fused output slab: [mean | logv | std | z]  ->  one wide store,
    # one output DMA stream per grid step.
    out_ref[...] = jnp.concatenate([heads, std, z], axis=-1)
    # TODO(synk): torch.distributions.Normal(mean, std) object itself is not
    # representable in a kernel; its parameters (mean, std) are returned.


# ----------------------------------------------------------------------------
# Wrapper
# ----------------------------------------------------------------------------
def _round_up(n, m):
    return ((n + m - 1) // m) * m


def conditional_vae_forward(x, c, eps, params, *, weight_dtype=jnp.bfloat16):
    """params: dict with
         'enc'  : list of (W [in,out] f32, b [1,out] f32) for the encoder stack
         'mean' : (W [h,latent], b [1,latent])
         'logv' : (W [h,latent], b [1,latent])
       Returns (z, mean, logv, std) — mean/std are the Normal dist parameters.
       NOTE: matmuls run with bf16 weights/activations (f32 accumulation), a
       deliberate deviation from the f32 PyTorch Linear layers (~2e-3 rtol).
    """
    batch, x_dim = x.shape
    c_dim = c.shape[1]
    latent = params["mean"][0].shape[1]
    enc = params["enc"]
    num_layers = len(enc)
    input_size = x_dim + c_dim

    # Layout / ordering assertions (see review correctness concerns).
    assert enc[0][0].shape[0] == input_size, "enc[0] W must be [x_dim+c_dim, h0]"
    assert latent % 128 == 0, "fused head/output slab needs lane-aligned latent"

    # x/c concat done ONCE here (trivially-fused XLA op); layer 0 becomes a
    # single full-K MXU pass inside the kernel.
    xc = jnp.concatenate([x, c], axis=-1)

    # Batch tiling: single block for small batches; otherwise tiles up to 256
    # rows (fills v6e/v7x MXU, amortizes per-step overhead) while keeping the
    # grid length >= 2 so both v7x TensorCores get work via ("parallel",).
    bp8 = _round_up(batch, 8)           # f32 sublane tile is 8 rows
    if bp8 <= 128:
        tm = bp8
    else:
        tm = min(256, _round_up((bp8 + 1) // 2, 8))
    bp = _round_up(batch, tm)
    pad = bp - batch
    if pad:
        xc = jnp.pad(xc, ((0, pad), (0, 0)))
        eps = jnp.pad(eps, ((0, pad), (0, 0)))

    # ---- pack parameters (done once, outside the kernel) --------------------
    flat_params = []
    for w, b in enc:
        flat_params += [w.astype(weight_dtype), b]
    # Fused heads: [W_mean | W_logv] -> one 2*latent-wide matmul.
    w_heads = jnp.concatenate(
        [params["mean"][0], params["logv"][0]], axis=1).astype(weight_dtype)
    b_heads = jnp.concatenate([params["mean"][1], params["logv"][1]], axis=1)
    flat_params += [w_heads, b_heads]

    inputs = [xc, eps] + flat_params

    def batch_spec(feat):
        return pl.BlockSpec((tm, feat), lambda i: (i, 0))

    in_specs = [batch_spec(input_size), batch_spec(latent)]
    # Grid-invariant weight/bias blocks (index -> (0,0)); Pallas skips re-DMA.
    in_specs += [pl.BlockSpec(p.shape, lambda i: (0, 0)) for p in flat_params]
    out_specs = batch_spec(4 * latent)
    out_shape = jax.ShapeDtypeStruct((bp, 4 * latent), jnp.float32)

    kernel = functools.partial(_cvae_kernel, num_layers, latent)

    slab = pl.pallas_call(
        kernel,
        out_shape=out_shape,
        grid=(bp // tm,),
        in_specs=in_specs,
        out_specs=out_specs,
        compiler_params=pltpu.CompilerParams(
            dimension_semantics=("parallel",)),
    )(*inputs)

    slab = slab[:batch]
    mean = slab[:, :latent]
    logv = slab[:, latent:2 * latent]
    std = slab[:, 2 * latent:3 * latent]
    z = slab[:, 3 * latent:]
    return z, mean, logv, std


# ----------------------------------------------------------------------------
# Deterministic parameter init (mimics torch.nn.Linear: U(-1/sqrt(in), 1/sqrt(in)))
# ----------------------------------------------------------------------------
def init_params(key, input_size, layer_sizes, latent_size):
    params = {"enc": []}
    in_dim = input_size
    for out_dim in layer_sizes:
        key, kw, kb = jax.random.split(key, 3)
        bound = 1.0 / np.sqrt(in_dim)
        w = jax.random.uniform(kw, (in_dim, out_dim), jnp.float32, -bound, bound)
        b = jax.random.uniform(kb, (1, out_dim), jnp.float32, -bound, bound)
        params["enc"].append((w, b))
        in_dim = out_dim

    for name in ("mean", "logv"):
        key, kw, kb = jax.random.split(key, 3)
        bound = 1.0 / np.sqrt(in_dim)
        w = jax.random.uniform(kw, (in_dim, latent_size), jnp.float32, -bound, bound)
        b = jax.random.uniform(kb, (1, latent_size), jnp.float32, -bound, bound)
        params[name] = (w, b)
    return params


# Pure-JAX reference of the same math (same bf16 weight/activation casts for
# the matmuls, f32 accumulation and f32 elementwise tail — matches kernel
# numerics).
def reference_forward(x, c, eps, params, weight_dtype=jnp.bfloat16):
    h = jnp.concatenate([x, c], axis=-1)
    for w, b in params["enc"]:
        h = jnp.maximum(
            jnp.dot(h.astype(weight_dtype), w.astype(weight_dtype),
                    preferred_element_type=jnp.float32) + b,
            0.0,
        )
    mean = jnp.dot(h.astype(weight_dtype),
                   params["mean"][0].astype(weight_dtype),
                   preferred_element_type=jnp.float32) + params["mean"][1]
    logv = jnp.dot(h.astype(weight_dtype),
                   params["logv"][0].astype(weight_dtype),
                   preferred_element_type=jnp.float32) + params["logv"][1]
    std = jnp.exp(0.5 * logv)
    z = eps * std + mean
    return z, mean, logv, std


# ----------------------------------------------------------------------------
# Main
# ----------------------------------------------------------------------------
if __name__ == "__main__":
    # Small configuration consistent with the module's forward:
    #   input_size = x_dim + c_dim, encoder = 2 Linear+ReLU layers.
    batch = 8
    x_dim, c_dim = 96, 32
    input_size = x_dim + c_dim           # 128
    layer_sizes = [256, 256]
    latent_size = 128

    key = jax.random.PRNGKey(0)
    key, kx, kc, keps, kp = jax.random.split(key, 5)

    x = jax.random.normal(kx, (batch, x_dim), jnp.float32)
    c = jax.random.normal(kc, (batch, c_dim), jnp.float32)
    eps = jax.random.normal(keps, (batch, latent_size), jnp.float32)  # torch.randn

    params = init_params(kp, input_size, layer_sizes, latent_size)

    z, mean, logv, std = conditional_vae_forward(x, c, eps, params)
    jax.block_until_ready((z, mean, logv, std))

    z_r, mean_r, logv_r, std_r = reference_forward(x, c, eps, params)
    for got, want in ((z, z_r), (mean, mean_r), (logv, logv_r), (std, std_r)):
        np.testing.assert_allclose(np.asarray(got), np.asarray(want),
                                   rtol=2e-3, atol=2e-3)

    # Larger batch: exercises the multi-block ("parallel") batch grid path
    # with the bigger (tm=256) tiles while keeping >= 2 grid blocks.
    batch2 = 512
    key, kx2, kc2, ke2 = jax.random.split(key, 4)
    x2 = jax.random.normal(kx2, (batch2, x_dim), jnp.float32)
    c2 = jax.random.normal(kc2, (batch2, c_dim), jnp.float32)
    eps2 = jax.random.normal(ke2, (batch2, latent_size), jnp.float32)

    outs2 = conditional_vae_forward(x2, c2, eps2, params)
    jax.block_until_ready(outs2)
    refs2 = reference_forward(x2, c2, eps2, params)
    for got, want in zip(outs2, refs2):
        np.testing.assert_allclose(np.asarray(got), np.asarray(want),
                                   rtol=2e-3, atol=2e-3)

    print("KERNEL_OK")
</pallas_src>

<mosaic_0001>
module attributes {stable_mosaic.version = 11 : i64} {
  func.func @_cvae_kernel(%arg0: i32, %arg1: memref<8x128xf32, #tpu.memory_space<vmem>>, %arg2: memref<8x128xf32, #tpu.memory_space<vmem>>, %arg3: memref<128x256xbf16, #tpu.memory_space<vmem>>, %arg4: memref<1x256xf32, #tpu.memory_space<vmem>>, %arg5: memref<256x256xbf16, #tpu.memory_space<vmem>>, %arg6: memref<1x256xf32, #tpu.memory_space<vmem>>, %arg7: memref<256x256xbf16, #tpu.memory_space<vmem>>, %arg8: memref<1x256xf32, #tpu.memory_space<vmem>>, %arg9: memref<8x512xf32, #tpu.memory_space<vmem>>) attributes {dimension_semantics = [#tpu.dimension_semantics<parallel>], iteration_bounds = array<i64: 1>, scalar_prefetch = 0 : i64, scratch_operands = 0 : i64, tpu.core_type = #tpu.core_type<tc>, window_params = [{transform_indices = @transform_0, window_bounds = array<i64: 8, 128>}, {transform_indices = @transform_1, window_bounds = array<i64: 8, 128>}, {pipeline_mode = #tpu.pipeline_mode<synchronous>, transform_indices = @transform_2, window_bounds = array<i64: 128, 256>}, {pipeline_mode = #tpu.pipeline_mode<synchronous>, transform_indices = @transform_3, window_bounds = array<i64: 1, 256>}, {pipeline_mode = #tpu.pipeline_mode<synchronous>, transform_indices = @transform_4, window_bounds = array<i64: 256, 256>}, {pipeline_mode = #tpu.pipeline_mode<synchronous>, transform_indices = @transform_5, window_bounds = array<i64: 1, 256>}, {pipeline_mode = #tpu.pipeline_mode<synchronous>, transform_indices = @transform_6, window_bounds = array<i64: 256, 256>}, {pipeline_mode = #tpu.pipeline_mode<synchronous>, transform_indices = @transform_7, window_bounds = array<i64: 1, 256>}, {transform_indices = @transform_8, window_bounds = array<i64: 8, 512>}]} {
    %c0 = arith.constant 0 : index
    %c0_0 = arith.constant 0 : index
    %0 = vector.load %arg1[%c0, %c0_0] : memref<8x128xf32, #tpu.memory_space<vmem>>, vector<8x128xf32>
    %c0_1 = arith.constant 0 : index
    %c0_2 = arith.constant 0 : index
    %1 = vector.load %arg2[%c0_1, %c0_2] : memref<8x128xf32, #tpu.memory_space<vmem>>, vector<8x128xf32>
    %2 = arith.truncf %0 : vector<8x128xf32> to vector<8x128xbf16>
    %c0_3 = arith.constant 0 : index
    %c0_4 = arith.constant 0 : index
    %3 = vector.load %arg3[%c0_3, %c0_4] : memref<128x256xbf16, #tpu.memory_space<vmem>>, vector<128x256xbf16>
    %c0_5 = arith.constant 0 : index
    %c0_6 = arith.constant 0 : index
    %4 = vector.load %arg4[%c0_5, %c0_6] : memref<1x256xf32, #tpu.memory_space<vmem>>, vector<1x256xf32>
    %cst = arith.constant dense<0.000000e+00> : vector<8x256xf32>
    %5 = tpu.matmul %2, %3, %cst {dimension_numbers = #tpu.dot_dimension_numbers<[1], [0], [0], [1], [0, 0, 1, 1], [], []>} : vector<8x128xbf16>, vector<128x256xbf16>, vector<8x256xf32> -> vector<8x256xf32>
    %6 = vector.broadcast %4 : vector<1x256xf32> to vector<8x256xf32>
    %7 = arith.addf %5, %6 : vector<8x256xf32>
    %cst_7 = arith.constant 0.000000e+00 : f32
    %8 = vector.broadcast %cst_7 : f32 to vector<8x256xf32>
    %9 = arith.maximumf %7, %8 : vector<8x256xf32>
    %10 = arith.truncf %9 : vector<8x256xf32> to vector<8x256xbf16>
    %c0_8 = arith.constant 0 : index
    %c0_9 = arith.constant 0 : index
    %11 = vector.load %arg5[%c0_8, %c0_9] : memref<256x256xbf16, #tpu.memory_space<vmem>>, vector<256x256xbf16>
    %c0_10 = arith.constant 0 : index
    %c0_11 = arith.constant 0 : index
    %12 = vector.load %arg6[%c0_10, %c0_11] : memref<1x256xf32, #tpu.memory_space<vmem>>, vector<1x256xf32>
    %cst_12 = arith.constant dense<0.000000e+00> : vector<8x256xf32>
    %13 = tpu.matmul %10, %11, %cst_12 {dimension_numbers = #tpu.dot_dimension_numbers<[1], [0], [0], [1], [0, 0, 1, 1], [], []>} : vector<8x256xbf16>, vector<256x256xbf16>, vector<8x256xf32> -> vector<8x256xf32>
    %14 = vector.broadcast %12 : vector<1x256xf32> to vector<8x256xf32>
    %15 = arith.addf %13, %14 : vector<8x256xf32>
    %cst_13 = arith.constant 0.000000e+00 : f32
    %16 = vector.broadcast %cst_13 : f32 to vector<8x256xf32>
    %17 = arith.maximumf %15, %16 : vector<8x256xf32>
    %18 = arith.truncf %17 : vector<8x256xf32> to vector<8x256xbf16>
    %c0_14 = arith.constant 0 : index
    %c0_15 = arith.constant 0 : index
    %19 = vector.load %arg7[%c0_14, %c0_15] : memref<256x256xbf16, #tpu.memory_space<vmem>>, vector<256x256xbf16>
    %c0_16 = arith.constant 0 : index
    %c0_17 = arith.constant 0 : index
    %20 = vector.load %arg8[%c0_16, %c0_17] : memref<1x256xf32, #tpu.memory_space<vmem>>, vector<1x256xf32>
    %cst_18 = arith.constant dense<0.000000e+00> : vector<8x256xf32>
    %21 = tpu.matmul %18, %19, %cst_18 {dimension_numbers = #tpu.dot_dimension_numbers<[1], [0], [0], [1], [0, 0, 1, 1], [], []>} : vector<8x256xbf16>, vector<256x256xbf16>, vector<8x256xf32> -> vector<8x256xf32>
    %22 = vector.broadcast %20 : vector<1x256xf32> to vector<8x256xf32>
    %23 = arith.addf %21, %22 : vector<8x256xf32>
    %24 = vector.extract_strided_slice %23 {offsets = [0, 0], sizes = [8, 128], strides = [1, 1]} : vector<8x256xf32> to vector<8x128xf32>
    %25 = vector.extract_strided_slice %23 {offsets = [0, 128], sizes = [8, 128], strides = [1, 1]} : vector<8x256xf32> to vector<8x128xf32>
    %cst_19 = arith.constant 5.000000e-01 : f32
    %26 = vector.broadcast %cst_19 : f32 to vector<8x128xf32>
    %27 = arith.mulf %26, %25 : vector<8x128xf32>
    %28 = math.exp %27 : vector<8x128xf32>
    %29 = arith.mulf %1, %28 : vector<8x128xf32>
    %30 = arith.addf %29, %24 : vector<8x128xf32>
    %31 = tpu.concatenate %23, %28, %30 in 1 : vector<8x256xf32>, vector<8x128xf32>, vector<8x128xf32> -> vector<8x512xf32>
    %c0_20 = arith.constant 0 : index
    %c0_21 = arith.constant 0 : index
    %32 = vector.load %arg9[%c0_20, %c0_21] : memref<8x512xf32, #tpu.memory_space<vmem>>, vector<8x512xf32>
    tpu.vector_store %arg9[%c0_20, %c0_21], %31 {strides = array<i32>} : memref<8x512xf32, #tpu.memory_space<vmem>>, vector<8x512xf32>,
    return
  }
  func.func @transform_0(%arg0: i32) -> (i32, i32) {
    %c0_i32 = arith.constant 0 : i32
    %c0_i32_0 = arith.constant 0 : i32
    return %arg0, %c0_i32 : i32, i32
  }
  func.func @transform_1(%arg0: i32) -> (i32, i32) {
    %c0_i32 = arith.constant 0 : i32
    %c0_i32_0 = arith.constant 0 : i32
    return %arg0, %c0_i32 : i32, i32
  }
  func.func @transform_2(%arg0: i32) -> (i32, i32) {
    %c0_i32 = arith.constant 0 : i32
    %c0_i32_0 = arith.constant 0 : i32
    %c0_i32_1 = arith.constant 0 : i32
    return %c0_i32, %c0_i32_0 : i32, i32
  }
  func.func @transform_3(%arg0: i32) -> (i32, i32) {
    %c0_i32 = arith.constant 0 : i32
    %c0_i32_0 = arith.constant 0 : i32
    %c0_i32_1 = arith.constant 0 : i32
    return %c0_i32, %c0_i32_0 : i32, i32
  }
  func.func @transform_4(%arg0: i32) -> (i32, i32) {
    %c0_i32 = arith.constant 0 : i32
    %c0_i32_0 = arith.constant 0 : i32
    %c0_i32_1 = arith.constant 0 : i32
    return %c0_i32, %c0_i32_0 : i32, i32
  }
  func.func @transform_5(%arg0: i32) -> (i32, i32) {
    %c0_i32 = arith.constant 0 : i32
    %c0_i32_0 = arith.constant 0 : i32
    %c0_i32_1 = arith.constant 0 : i32
    return %c0_i32, %c0_i32_0 : i32, i32
  }
  func.func @transform_6(%arg0: i32) -> (i32, i32) {
    %c0_i32 = arith.constant 0 : i32
    %c0_i32_0 = arith.constant 0 : i32
    %c0_i32_1 = arith.constant 0 : i32
    return %c0_i32, %c0_i32_0 : i32, i32
  }
  func.func @transform_7(%arg0: i32) -> (i32, i32) {
    %c0_i32 = arith.constant 0 : i32
    %c0_i32_0 = arith.constant 0 : i32
    %c0_i32_1 = arith.constant 0 : i32
    return %c0_i32, %c0_i32_0 : i32, i32
  }
  func.func @transform_8(%arg0: i32) -> (i32, i32) {
    %c0_i32 = arith.constant 0 : i32
    %c0_i32_0 = arith.constant 0 : i32
    return %arg0, %c0_i32 : i32, i32
  }
}

</mosaic_0001>

<bundles_post_ra>
// kernel: tpu_custom_call.1
= control target key start
LH: loop header
LB: loop body
LE: loop exit
PB: predicated region body
PF: predicated region fallthrough
CT: control target
= control target key end

     0   :  { %13 = vsyncpa [#allocation3], 0  ;;  %s1266_s0 = inlined_call_operand.hbm [shape: f32[8,128], index: 0, kind: input, shape index: {}]   ;;  %s1267_s1 = inlined_call_operand.hbm [shape: f32[8,128], index: 1, kind: input, shape index: {}]   ;;  %s1268_s2 = inlined_call_operand.hbm [shape: bf16[128,256], index: 2, kind: input, shape index: {}]   ;;  %s1269_s3 = inlined_call_operand.vmem [shape: f32[1,256], index: 3, kind: input, shape index: {}]   ;;  %s1270_s4 = inlined_call_operand.hbm [shape: bf16[256,256], index: 4, kind: input, shape index: {}]   ;;  %s1271_s5 = inlined_call_operand.vmem [shape: f32[1,256], index: 5, kind: input, shape index: {}]   ;;  %s1272_s6 = inlined_call_operand.hbm [shape: bf16[256,256], index: 6, kind: input, shape index: {}]   ;;  %s1273_s7 = inlined_call_operand.vmem [shape: f32[1,256], index: 7, kind: input, shape index: {}]   ;;  %s1274_s8 = inlined_call_operand.hbm [shape: f32[8,512], index: 8, kind: output, shape index: {}]  }
   0x1   :  { %14 = vsyncpa [#allocation6], 0 }
   0x2   :  { %15 = vsyncpa [#allocation9], 0 }
   0x3   :  { %16 = vsyncpa [#allocation4], 0  ;;  %s1122_s27 = smov [#allocation5]   ;;  %s982_s9 = scalar_lea.hbm %s1267_s1, 128 }
   0x4   :  { %s33_s28 = sshll.u32 %s1122_s27, 4  ;;  %p983_p0 = scmp.ne.s32.totalorder %s1267_s1, %s982_s9  ;;  %s34_s28 = int_to_ptr.vmem [resolvable:$true] %s33_s28 }
   0x5   :  { %p986_p1 = scmp.lt.u32.totalorder %s982_s9, %s1267_s1 }
   0x7   :  { %p988_p2 = pnand %p986_p1, %p983_p0 }
   0x9   :  { %991 = shalt.err (!%p988_p2)
}
   0xa   :  { %s992_s14 = scalar_lea.vmem %s34_s28, 128  ;;  %p997_p4 = scmp.lt.s32.totalorder %s34_s28, %s34_s28 }
   0xb   :  { %p993_p3 = scmp.ne.s32.totalorder %s34_s28, %s992_s14  ;;  %p998_p5 = scmp.lt.s32.totalorder %s992_s14, %s992_s14 }
   0xd   :  { %p999_p6 = por %p998_p5, %p997_p4 }
   0xf   :  { %p1000_p7 = pnand %p999_p6, %p993_p3 }
  0x11   :  { %1003 = shalt.err (!%p1000_p7)
}
  0x12   :  { %36 = dma.hbm_to_vmem [thread:$0]  %s1267_s1, 128, %s34_s28, [#allocation6]  }
  0x13   :  { %s1123_s17 = smov [#allocation8]   ;;  %s1124_s19 = smov [#allocation2]  }
  0x14   :  { %s56_s18 = sshll.u32 %s1123_s17, 4  ;;  %s23_s20 = sshll.u32 %s1124_s19, 4  ;;  %s57_s18 = int_to_ptr.vmem [resolvable:$true] %s56_s18  ;;  %s24_s20 = int_to_ptr.vmem [resolvable:$true] %s23_s20 }
  0x15   :  { %s1004_s23 = scalar_lea.hbm %s1270_s4, 4096 }
  0x16   :  { %p1005_p8 = scmp.ne.s32.totalorder %s1270_s4, %s1004_s23  ;;  %p1008_p9 = scmp.lt.u32.totalorder %s1004_s23, %s1270_s4 }
  0x18   :  { %p1010_p10 = pnand %p1008_p9, %p1005_p8 }
  0x1a   :  { %1013 = shalt.err (!%p1010_p10)
}
  0x1b   :  { %s1014_s1 = scalar_lea.vmem %s57_s18, 4096  ;;  %p1019_p12 = scmp.lt.s32.totalorder %s57_s18, %s57_s18 }
  0x1c   :  { %p1015_p11 = scmp.ne.s32.totalorder %s57_s18, %s1014_s1  ;;  %p1020_p13 = scmp.lt.s32.totalorder %s1014_s1, %s1014_s1 }
  0x1e   :  { %p1021_p0 = por %p1020_p13, %p1019_p12 }
  0x20   :  { %p1022_p1 = pnand %p1021_p0, %p1015_p11 }
  0x22   :  { %1025 = shalt.err (!%p1022_p1)
}
  0x23   :  { %s1125_s28 = smov 128   ;;  %s1126_s29 = smov 8  }
  0x24   :  { %62 = dma.hbm_to_vmem [thread:$0]  %s1270_s4, 4096, %s57_s18, [#allocation9], %s1125_s28, %s1125_s28, %s1126_s29  }
  0x25   :  { %s1026_s12 = scalar_lea.hbm %s1266_s0, 128 }
  0x26   :  { %p1027_p2 = scmp.ne.s32.totalorder %s1266_s0, %s1026_s12  ;;  %p1030_p3 = scmp.lt.u32.totalorder %s1026_s12, %s1266_s0 }
  0x28   :  { %p1032_p4 = pnand %p1030_p3, %p1027_p2 }
  0x2a   :  { %1035 = shalt.err (!%p1032_p4)
}
  0x2b   :  { %s1036_s17 = scalar_lea.vmem %s24_s20, 128  ;;  %p1041_p6 = scmp.lt.s32.totalorder %s24_s20, %s24_s20 }
  0x2c   :  { %p1037_p5 = scmp.ne.s32.totalorder %s24_s20, %s1036_s17  ;;  %p1042_p7 = scmp.lt.s32.totalorder %s1036_s17, %s1036_s17 }
  0x2e   :  { %p1043_p8 = por %p1042_p7, %p1041_p6 }
  0x30   :  { %p1044_p9 = pnand %p1043_p8, %p1037_p5 }
  0x32   :  { %1047 = shalt.err (!%p1044_p9)
}
  0x33   :  { %26 = dma.hbm_to_vmem [thread:$0]  %s1266_s0, 128, %s24_s20, [#allocation3]  }
  0x34   :  { %s1127_s19 = smov [#allocation7]   ;;  %s1128_s22 = smov [#allocation10]  }
  0x35   :  { %s42_s21 = sshll.u32 %s1127_s19, 4  ;;  %s70_s23 = sshll.u32 %s1128_s22, 4  ;;  %s43_s21 = int_to_ptr.vmem [resolvable:$true] %s42_s21  ;;  %s71_s23 = int_to_ptr.vmem [resolvable:$true] %s70_s23 }
  0x36   :  { %s1048_s26 = scalar_lea.hbm %s1268_s2, 2048 }
  0x37   :  { %p1049_p10 = scmp.ne.s32.totalorder %s1268_s2, %s1048_s26  ;;  %p1052_p11 = scmp.lt.u32.totalorder %s1048_s26, %s1268_s2 }
  0x39   :  { %p1054_p12 = pnand %p1052_p11, %p1049_p10 }
  0x3b   :  { %1057 = shalt.err (!%p1054_p12)
}
  0x3c   :  { %s1058_s0 = scalar_lea.vmem %s43_s21, 2048  ;;  %p1063_p0 = scmp.lt.s32.totalorder %s43_s21, %s43_s21 }
  0x3d   :  { %p1059_p13 = scmp.ne.s32.totalorder %s43_s21, %s1058_s0  ;;  %p1064_p1 = scmp.lt.s32.totalorder %s1058_s0, %s1058_s0 }
  0x3f   :  { %p1065_p2 = por %p1064_p1, %p1063_p0 }
  0x41   :  { %p1066_p3 = pnand %p1065_p2, %p1059_p13 }
  0x43   :  { %1069 = shalt.err (!%p1066_p3)
}
  0x44   :  { %48 = dma.hbm_to_vmem [thread:$0]  %s1268_s2, 2048, %s43_s21, [#allocation6], %s1125_s28, %s1125_s28, %s1126_s29  }
  0x45   :  { %s1070_s13 = scalar_lea.hbm %s1272_s6, 4096 }
  0x46   :  { %p1071_p4 = scmp.ne.s32.totalorder %s1272_s6, %s1070_s13  ;;  %p1074_p5 = scmp.lt.u32.totalorder %s1070_s13, %s1272_s6 }
  0x48   :  { %p1076_p6 = pnand %p1074_p5, %p1071_p4 }
  0x4a   :  { %1079 = shalt.err (!%p1076_p6)
}
  0x4b   :  { %s1080_s4 = scalar_lea.vmem %s71_s23, 4096  ;;  %p1085_p8 = scmp.lt.s32.totalorder %s71_s23, %s71_s23 }
  0x4c   :  { %p1081_p7 = scmp.ne.s32.totalorder %s71_s23, %s1080_s4  ;;  %p1086_p9 = scmp.lt.s32.totalorder %s1080_s4, %s1080_s4 }
  0x4e   :  { %p1087_p10 = por %p1086_p9, %p1085_p8 }
  0x50   :  { %p1088_p11 = pnand %p1087_p10, %p1081_p7 }
  0x52   :  { %1091 = shalt.err (!%p1088_p11)
}
  0x53   :  { %76 = dma.hbm_to_vmem [thread:$0]  %s1272_s6, 4096, %s71_s23, [#allocation9], %s1125_s28, %s1125_s28, %s1126_s29  }
  0x54   :  { %1114 = dma.done.wait [#allocation3], 128  }
  0x55   :  { %1115 = vsyncadd [#allocation3], 4294967168 }
  0x56   :  { %1116 = dma.done.wait [#allocation6], 2176  }
  0x57   :  { %1117 = vsyncadd [#allocation6], 4294965120 }
  0x58   :  { %1118 = dma.done.wait [#allocation9], 8192  }
  0x59   :  { %1119 = vsyncadd [#allocation9], 4294959104  ;;  %v1129_v0 = vmov 0   ;;  %v860_v1 = vld [vmem:[#allocation7 + $0x4] ss:$8 sps:$4 sm:$0xff]   ;;  %v95_v26 = vld [vmem:[#allocation2] sm:$0xff] }
  0x5a   :  { %238 = vmatprep.mubr.bf16.mxu0 %v1129_v0  ;;  %v862_v2 = vld [vmem:[#allocation7] ss:$8 sps:$4 sm:$0xff]   ;;  %206 = vmatprep.subr.bf16.mxu0 %v860_v1  ;;  %v863_v3 = vld [vmem:[#allocation7 + $0x14] ss:$8 sps:$4 sm:$0xff]   ;;  %v865_v4 = vld [vmem:[#allocation7 + $0x10] ss:$8 sps:$4 sm:$0xff]   ;;  %v97_v31 = vpack.c.bf16 %v95_v26, %v95_v26 }
  0x5b   :  { %207 = vmatpush1.bf16.msra.mxu0 %v862_v2  ;;  %v866_v5 = vld [vmem:[#allocation7 + $0x24] ss:$8 sps:$4 sm:$0xff]   ;;  %v868_v6 = vld [vmem:[#allocation7 + $0x20] ss:$8 sps:$4 sm:$0xff]   ;;  %v869_v7 = vld [vmem:[#allocation7 + $0x34] ss:$8 sps:$4 sm:$0xff]  }
  0x5c   :  { %208 = vmatprep.subr.bf16.mxu0 %v863_v3  ;;  %v871_v8 = vld [vmem:[#allocation7 + $0x30] ss:$8 sps:$4 sm:$0xff]   ;;  %v872_v9 = vld [vmem:[#allocation7 + $0x44] ss:$8 sps:$4 sm:$0xff]   ;;  %v886_v11 = vld [vmem:[#allocation8] ss:$8 sps:$4 sm:$0xff]  }
  0x5d   :  { %v884_v10 = vld [vmem:[#allocation8 + $0x4] ss:$8 sps:$4 sm:$0xff]   ;;  %v887_v12 = vld [vmem:[#allocation8 + $0x14] ss:$8 sps:$4 sm:$0xff]   ;;  %v874_v13 = vld [vmem:[#allocation7 + $0x40] ss:$8 sps:$4 sm:$0xff]  }
  0x5e   :  { %455 = vmatprep.subr.bf16.mxu1 %v884_v10  ;;  %v889_v14 = vld [vmem:[#allocation8 + $0x10] ss:$8 sps:$4 sm:$0xff]   ;;  %v890_v15 = vld [vmem:[#allocation8 + $0x24] ss:$8 sps:$4 sm:$0xff]   ;;  %v875_v16 = vld [vmem:[#allocation7 + $0x54] ss:$8 sps:$4 sm:$0xff]  }
  0x5f   :  { %209 = vmatpush1.bf16.msra.mxu0 %v865_v4  ;;  %456 = vmatpush1.bf16.msra.mxu1 %v886_v11  ;;  %v877_v17 = vld [vmem:[#allocation7 + $0x50] ss:$8 sps:$4 sm:$0xff]   ;;  %v892_v18 = vld [vmem:[#allocation8 + $0x20] ss:$8 sps:$4 sm:$0xff]   ;;  %v893_v19 = vld [vmem:[#allocation8 + $0x34] ss:$8 sps:$4 sm:$0xff]  }
  0x60   :  { %210 = vmatprep.subr.bf16.mxu0 %v866_v5  ;;  %457 = vmatprep.subr.bf16.mxu1 %v887_v12  ;;  %v878_v20 = vld [vmem:[#allocation7 + $0x64] ss:$8 sps:$4 sm:$0xff]   ;;  %v880_v21 = vld [vmem:[#allocation7 + $0x60] ss:$8 sps:$4 sm:$0xff]   ;;  %v895_v22 = vld [vmem:[#allocation8 + $0x30] ss:$8 sps:$4 sm:$0xff]  }
  0x61   :  { %v896_v23 = vld [vmem:[#allocation8 + $0x44] ss:$8 sps:$4 sm:$0xff]   ;;  %v881_v24 = vld [vmem:[#allocation7 + $0x74] ss:$8 sps:$4 sm:$0xff]   ;;  %v883_v25 = vld [vmem:[#allocation7 + $0x70] ss:$8 sps:$4 sm:$0xff]  }
  0x62   :  { %v898_v27 = vld [vmem:[#allocation8 + $0x40] ss:$8 sps:$4 sm:$0xff]   ;;  %v899_v28 = vld [vmem:[#allocation8 + $0x54] ss:$8 sps:$4 sm:$0xff]   ;;  %v901_v29 = vld [vmem:[#allocation8 + $0x50] ss:$8 sps:$4 sm:$0xff]  }
  0x63   :  { %211 = vmatpush1.bf16.msra.mxu0 %v868_v6  ;;  %458 = vmatpush1.bf16.msra.mxu1 %v889_v14  ;;  %v902_v30 = vld [vmem:[#allocation8 + $0x64] ss:$8 sps:$4 sm:$0xff]   ;;  %v904_v32 = vld [vmem:[#allocation8 + $0x60] ss:$8 sps:$4 sm:$0xff]   ;;  %v905_v33 = vld [vmem:[#allocation8 + $0x74] ss:$8 sps:$4 sm:$0xff]  }
  0x64   :  { %212 = vmatprep.subr.bf16.mxu0 %v869_v7  ;;  %459 = vmatprep.subr.bf16.mxu1 %v890_v15  ;;  %v907_v34 = vld [vmem:[#allocation8 + $0x70] ss:$8 sps:$4 sm:$0xff]   ;;  %v908_v35 = vld [vmem:[#allocation8 + $0x84] ss:$8 sps:$4 sm:$0xff]   ;;  %v910_v36 = vld [vmem:[#allocation8 + $0x80] ss:$8 sps:$4 sm:$0xff]   ;;  %v116_v15 = vlaneseq }
  0x65   :  { %v911_v37 = vld [vmem:[#allocation8 + $0x94] ss:$8 sps:$4 sm:$0xff]   ;;  %v913_v38 = vld [vmem:[#allocation8 + $0x90] ss:$8 sps:$4 sm:$0xff]   ;;  %v914_v39 = vld [vmem:[#allocation8 + $0xa4] ss:$8 sps:$4 sm:$0xff]  }
  0x66   :  { %v916_v40 = vld [vmem:[#allocation8 + $0xa0] ss:$8 sps:$4 sm:$0xff]   ;;  %v917_v41 = vld [vmem:[#allocation8 + $0xb4] ss:$8 sps:$4 sm:$0xff]   ;;  %v919_v42 = vld [vmem:[#allocation8 + $0xb0] ss:$8 sps:$4 sm:$0xff]  }
  0x67   :  { %213 = vmatpush1.bf16.msra.mxu0 %v871_v8  ;;  %460 = vmatpush1.bf16.msra.mxu1 %v892_v18  ;;  %v920_v43 = vld [vmem:[#allocation8 + $0xc4] ss:$8 sps:$4 sm:$0xff]   ;;  %v922_v44 = vld [vmem:[#allocation8 + $0xc0] ss:$8 sps:$4 sm:$0xff]   ;;  %v923_v45 = vld [vmem:[#allocation8 + $0xd4] ss:$8 sps:$4 sm:$0xff]  }
  0x68   :  { %214 = vmatprep.subr.bf16.mxu0 %v872_v9  ;;  %461 = vmatprep.subr.bf16.mxu1 %v893_v19  ;;  %v925_v46 = vld [vmem:[#allocation8 + $0xd0] ss:$8 sps:$4 sm:$0xff]   ;;  %v926_v47 = vld [vmem:[#allocation8 + $0xe4] ss:$8 sps:$4 sm:$0xff]   ;;  %v928_v48 = vld [vmem:[#allocation8 + $0xe0] ss:$8 sps:$4 sm:$0xff]  }
  0x69   :  { %v929_v49 = vld [vmem:[#allocation8 + $0xf4] ss:$8 sps:$4 sm:$0xff]   ;;  %v931_v50 = vld [vmem:[#allocation8 + $0xf0] ss:$8 sps:$4 sm:$0xff]   ;;  %v932_v51 = vld [vmem:[#allocation10] ss:$8 sps:$4 sm:$0xff]  }
  0x6a   :  { %v934_v52 = vld [vmem:[#allocation10 + $0x4] ss:$8 sps:$4 sm:$0xff]   ;;  %v937_v53 = vld [vmem:[#allocation10 + $0x14] ss:$8 sps:$4 sm:$0xff]   ;;  %v935_v54 = vld [vmem:[#allocation10 + $0x10] ss:$8 sps:$4 sm:$0xff]  }
  0x6b   :  { %215 = vmatpush1.bf16.msra.mxu0 %v874_v13  ;;  %462 = vmatpush1.bf16.msra.mxu1 %v895_v22  ;;  %v940_v55 = vld [vmem:[#allocation10 + $0x24] ss:$8 sps:$4 sm:$0xff]   ;;  %v938_v56 = vld [vmem:[#allocation10 + $0x20] ss:$8 sps:$4 sm:$0xff]   ;;  %v943_v57 = vld [vmem:[#allocation10 + $0x34] ss:$8 sps:$4 sm:$0xff]  }
  0x6c   :  { %216 = vmatprep.subr.bf16.mxu0 %v875_v16  ;;  %463 = vmatprep.subr.bf16.mxu1 %v896_v23  ;;  %v941_v58 = vld [vmem:[#allocation10 + $0x30] ss:$8 sps:$4 sm:$0xff]   ;;  %v946_v59 = vld [vmem:[#allocation10 + $0x44] ss:$8 sps:$4 sm:$0xff]   ;;  %v944_v60 = vld [vmem:[#allocation10 + $0x40] ss:$8 sps:$4 sm:$0xff]  }
  0x6d   :  { %v949_v61 = vld [vmem:[#allocation10 + $0x54] ss:$8 sps:$4 sm:$0xff]   ;;  %v947_v62 = vld [vmem:[#allocation10 + $0x50] ss:$8 sps:$4 sm:$0xff]   ;;  %v952_v63 = vld [vmem:[#allocation10 + $0x64] ss:$8 sps:$4 sm:$0xff]  }
  0x6e   :  { %v950_v0 = vld [vmem:[#allocation10 + $0x60] ss:$8 sps:$4 sm:$0xff]   ;;  %v955_v1 = vld [vmem:[#allocation10 + $0x74] ss:$8 sps:$4 sm:$0xff]   ;;  %v953_v2 = vld [vmem:[#allocation10 + $0x70] ss:$8 sps:$4 sm:$0xff]  }
  0x6f   :  { %217 = vmatpush1.bf16.msra.mxu0 %v877_v17  ;;  %464 = vmatpush1.bf16.msra.mxu1 %v898_v27  ;;  %v958_v3 = vld [vmem:[#allocation10 + $0x84] ss:$8 sps:$4 sm:$0xff]   ;;  %v956_v4 = vld [vmem:[#allocation10 + $0x80] ss:$8 sps:$4 sm:$0xff]   ;;  %v961_v5 = vld [vmem:[#allocation10 + $0x94] ss:$8 sps:$4 sm:$0xff]  }
  0x70   :  { %218 = vmatprep.subr.bf16.mxu0 %v878_v20  ;;  %465 = vmatprep.subr.bf16.mxu1 %v899_v28  ;;  %v959_v6 = vld [vmem:[#allocation10 + $0x90] ss:$8 sps:$4 sm:$0xff]   ;;  %v964_v7 = vld [vmem:[#allocation10 + $0xa4] ss:$8 sps:$4 sm:$0xff]   ;;  %v962_v8 = vld [vmem:[#allocation10 + $0xa0] ss:$8 sps:$4 sm:$0xff]  }
  0x71   :  { %v967_v9 = vld [vmem:[#allocation10 + $0xb4] ss:$8 sps:$4 sm:$0xff]   ;;  %v965_v10 = vld [vmem:[#allocation10 + $0xb0] ss:$8 sps:$4 sm:$0xff]   ;;  %v970_v11 = vld [vmem:[#allocation10 + $0xc4] ss:$8 sps:$4 sm:$0xff]  }
  0x72   :  { %v968_v12 = vld [vmem:[#allocation10 + $0xc0] ss:$8 sps:$4 sm:$0xff]   ;;  %v973_v13 = vld [vmem:[#allocation10 + $0xd4] ss:$8 sps:$4 sm:$0xff]   ;;  %v971_v14 = vld [vmem:[#allocation10 + $0xd0] ss:$8 sps:$4 sm:$0xff]  }
  0x73   :  { %219 = vmatpush1.bf16.msra.mxu0 %v880_v21  ;;  %466 = vmatpush1.bf16.msra.mxu1 %v901_v29  ;;  %v117_v16 = vshrl.u32 %v116_v15, 7  ;;  %v114_v18 = vld [vmem:[%s1269_s3] sm:$0x3] }
  0x74   :  { %220 = vmatprep.subr.bf16.mxu0 %v881_v24  ;;  %467 = vmatprep.subr.bf16.mxu1 %v902_v30 }
  0x75   :  { %v118_v17 = vsub.s32 0, %v117_v16  ;;  %v122_v19 = vsub.s32 1, %v117_v16 }
  0x77   :  { %221 = vmatpush1.bf16.msra.mxu0 %v883_v25  ;;  %468 = vmatpush1.bf16.msra.mxu1 %v904_v32  ;;  %v119_v20 = vrot.slane %v114_v18, %v118_v17  ;;  %v123_v21 = vrot.slane %v114_v18, %v122_v19  ;;  %v976_v32 = vld [vmem:[#allocation10 + $0xe4] ss:$8 sps:$4 sm:$0xff]  }
  0x78   :  { %469 = vmatprep.subr.bf16.mxu1 %v905_v33  ;;  %704 = vmatprep.subr.bf16.mxu0 %v934_v52  ;;  %v974_v33 = vld [vmem:[#allocation10 + $0xe0] ss:$8 sps:$4 sm:$0xff]  }
  0x7a   :  { %239 = vmatmul.mubr.bf16.vlgmr.msra.gmra.mrb[0].mxu0 %v97_v31 }
  0x7b   :  { %470 = vmatpush1.bf16.msra.mxu1 %v907_v34  ;;  %705 = vmatpush1.bf16.msra.mxu0 %v932_v51  ;;  %v979_v34 = vld [vmem:[#allocation10 + $0xf4] ss:$8 sps:$4 sm:$0xff]  }
  0x7c   :  { %471 = vmatprep.subr.bf16.mxu1 %v908_v35  ;;  %706 = vmatprep.subr.bf16.mxu0 %v937_v53  ;;  %v977_v35 = vld [vmem:[#allocation10 + $0xf0] ss:$8 sps:$4 sm:$0xff]  }
  0x7f   :  { %472 = vmatpush1.bf16.msra.mxu1 %v910_v36  ;;  %707 = vmatpush1.bf16.msra.mxu0 %v935_v54  ;;  %v283_v36 = vld [vmem:[%s1271_s5] sm:$0x3]  ;;  %s1130_s5 = smov [#allocation11]  }
  0x80   :  { %473 = vmatprep.subr.bf16.mxu1 %v911_v37  ;;  %708 = vmatprep.subr.bf16.mxu0 %v940_v55  ;;  %v288_v37 = vrot.slane %v283_v36, %v118_v17  ;;  %s760_s22 = sshll.u32 %s1130_s5, 4  ;;  %s761_s22 = int_to_ptr.vmem [resolvable:$true] %s760_s22 }
  0x81   :  { %p1097_p13 = scmp.lt.s32.totalorder %s761_s22, %s761_s22 }
  0x83   :  { %474 = vmatpush1.bf16.msra.mxu1 %v913_v38  ;;  %709 = vmatpush1.bf16.msra.mxu0 %v938_v56  ;;  %v292_v38 = vrot.slane %v283_v36, %v122_v19 }
  0x84   :  { %475 = vmatprep.subr.bf16.mxu1 %v914_v39  ;;  %710 = vmatprep.subr.bf16.mxu0 %v943_v57 }
  0x87   :  { %476 = vmatpush1.bf16.msra.mxu1 %v916_v40  ;;  %711 = vmatpush1.bf16.msra.mxu0 %v941_v58 }
  0x88   :  { %477 = vmatprep.subr.bf16.mxu1 %v917_v41  ;;  %712 = vmatprep.subr.bf16.mxu0 %v946_v59 }
  0x8b   :  { %478 = vmatpush1.bf16.msra.mxu1 %v919_v42  ;;  %713 = vmatpush1.bf16.msra.mxu0 %v944_v60  ;;  %v96_v60 = vld [vmem:[#allocation5] sm:$0xff] }
  0x8c   :  { %479 = vmatprep.subr.bf16.mxu1 %v920_v43  ;;  %714 = vmatprep.subr.bf16.mxu0 %v949_v61 }
  0x8f   :  { %480 = vmatpush1.bf16.msra.mxu1 %v922_v44  ;;  %715 = vmatpush1.bf16.msra.mxu0 %v947_v62 }
  0x90   :  { %481 = vmatprep.subr.bf16.mxu1 %v923_v45  ;;  %716 = vmatprep.subr.bf16.mxu0 %v952_v63 }
  0x93   :  { %482 = vmatpush1.bf16.msra.mxu1 %v925_v46  ;;  %717 = vmatpush1.bf16.msra.mxu0 %v950_v0 }
  0x94   :  { %483 = vmatprep.subr.bf16.mxu1 %v926_v47  ;;  %718 = vmatprep.subr.bf16.mxu0 %v955_v1 }
  0x97   :  { %484 = vmatpush1.bf16.msra.mxu1 %v928_v48  ;;  %719 = vmatpush1.bf16.msra.mxu0 %v953_v2 }
  0x98   :  { %485 = vmatprep.subr.bf16.mxu1 %v929_v49  ;;  %720 = vmatprep.subr.bf16.mxu0 %v958_v3  ;;  %v532_v49 = vld [vmem:[%s1273_s7] sm:$0x3]  ;;  %s1092_s7 = scalar_lea.vmem %s761_s22, 512 }
  0x99   :  { %v541_v51 = vrot.slane %v532_v49, %v122_v19  ;;  %p1093_p12 = scmp.ne.s32.totalorder %s761_s22, %s1092_s7  ;;  %p1098_p0 = scmp.lt.s32.totalorder %s1092_s7, %s1092_s7 }
  0x9b   :  { %486 = vmatpush1.bf16.msra.mxu1 %v931_v50  ;;  %721 = vmatpush1.bf16.msra.mxu0 %v956_v4  ;;  %v537_v50 = vrot.slane %v532_v49, %v118_v17  ;;  %p1099_p1 = por %p1098_p0, %p1097_p13 }
  0x9c   :  { %722 = vmatprep.subr.bf16.mxu0 %v961_v5 }
  0x9d   :  { %p1100_p2 = pnand %p1099_p1, %p1093_p12 }
  0x9f   :  { %723 = vmatpush1.bf16.msra.mxu0 %v959_v6 }
  0xa0   :  { %724 = vmatprep.subr.bf16.mxu0 %v964_v7 }
  0xa3   :  { %725 = vmatpush1.bf16.msra.mxu0 %v962_v8 }
  0xa4   :  { %726 = vmatprep.subr.bf16.mxu0 %v967_v9 }
  0xa7   :  { %727 = vmatpush1.bf16.msra.mxu0 %v965_v10 }
  0xa8   :  { %728 = vmatprep.subr.bf16.mxu0 %v970_v11 }
  0xab   :  { %729 = vmatpush1.bf16.msra.mxu0 %v968_v12 }
  0xac   :  { %730 = vmatprep.subr.bf16.mxu0 %v973_v13 }
  0xaf   :  { %731 = vmatpush1.bf16.msra.mxu0 %v971_v14 }
  0xb0   :  { %732 = vmatprep.subr.bf16.mxu0 %v976_v32 }
  0xb3   :  { %733 = vmatpush1.bf16.msra.mxu0 %v974_v33 }
  0xb4   :  { %734 = vmatprep.subr.bf16.mxu0 %v979_v34 }
  0xb7   :  { %735 = vmatpush1.bf16.msra.mxu0 %v977_v35 }
 0x14d   :  { %v240_v22 = vpop.f32.mrb[0].mxu0 }
 0x14e   :  { %v241_v23 = vadd.f32 %v240_v22, %v119_v20  ;;  %v242_v24 = vpop.f32.mrb[1].mxu0 }
 0x14f   :  { %v243_v25 = vadd.f32 %v242_v24, %v123_v21  ;;  %v244_v26 = vpop.f32.mrb[2].mxu0 }
 0x150   :  { %v247_v27 = vmax.f32 %v241_v23, 0.0  ;;  %v245_v28 = vpop.f32.mrb[3].mxu0 }
 0x151   :  { %v248_v29 = vmax.f32 %v243_v25, 0.0 }
 0x152   :  { %v249_v31 = vpack.c.bf16 %v247_v27, %v247_v27 }
 0x153   :  { %v250_v30 = vpack.c.bf16 %v248_v29, %v248_v29 }
 0x155   :  { %487 = vmatprep.mubr.bf16.mxu1 %v250_v30 }
 0x156   :  { %488 = vmatmul.mubr.bf16.vlgmr.msra.gmra.mrb[0].mxu1 %v249_v31 }
 0x229   :  { %v489_v39 = vpop.f32.mrb[0].mxu1 }
 0x22a   :  { %v490_v40 = vadd.f32 %v489_v39, %v288_v37  ;;  %v491_v41 = vpop.f32.mrb[1].mxu1 }
 0x22b   :  { %v492_v42 = vadd.f32 %v491_v41, %v292_v38  ;;  %v493_v43 = vpop.f32.mrb[2].mxu1 }
 0x22c   :  { %v496_v44 = vmax.f32 %v490_v40, 0.0  ;;  %v494_v45 = vpop.f32.mrb[3].mxu1 }
 0x22d   :  { %v497_v46 = vmax.f32 %v492_v42, 0.0 }
 0x22e   :  { %v498_v48 = vpack.c.bf16 %v496_v44, %v496_v44 }
 0x22f   :  { %v499_v47 = vpack.c.bf16 %v497_v46, %v497_v46 }
 0x231   :  { %736 = vmatprep.mubr.bf16.mxu0 %v499_v47 }
 0x232   :  { %737 = vmatmul.mubr.bf16.vlgmr.msra.gmra.mrb[4].mxu0 %v498_v48 }
 0x305   :  { %v738_v52 = vpop.f32.mrb[4].mxu0 }
 0x306   :  { %v739_v53 = vadd.f32 %v738_v52, %v537_v50  ;;  %v740_v54 = vpop.f32.mrb[5].mxu0 }
 0x307   :  { %v741_v55 = vadd.f32 %v740_v54, %v541_v51  ;;  %v742_v56 = vpop.f32.mrb[6].mxu0 }
 0x308   :  { %750 = vst [vmem:[#allocation11] sm:$0xff] %v739_v53  ;;  %v743_v57 = vpop.f32.mrb[7].mxu0 }
 0x309   :  { %v745_v58 = vmul.f32 0.5, %v741_v55  ;;  %751 = vst [vmem:[#allocation11 + $0x8] sm:$0xff] %v741_v55 }
 0x30b   :  { %v746_v59 = vmul.f32 1.442695, %v745_v58 }
 0x30d   :  { %980 = vpow2.f32 %v746_v59 }
 0x317   :  { %v981_v61 = vpop.eup %980 }
 0x318   :  { %752 = vst [vmem:[#allocation11 + $0x10] sm:$0xff] %v981_v61  ;;  %v748_v62 = vmul.f32 %v981_v61, %v96_v60 }
 0x31a   :  { %v749_v63 = vadd.f32 %v748_v62, %v739_v53 }
 0x31c   :  { %753 = vst [vmem:[#allocation11 + $0x18] sm:$0xff] %v749_v63 }
 0x31d   :  { %1103 = shalt.err (!%p1100_p2)
}
 0x31e   :  { %s1104_s25 = scalar_lea.hbm %s1274_s8, 512 }
 0x31f   :  { %p1105_p3 = scmp.ne.s32.totalorder %s1274_s8, %s1104_s25  ;;  %p1108_p4 = scmp.lt.u32.totalorder %s1104_s25, %s1274_s8 }
 0x321   :  { %p1110_p5 = pnand %p1108_p4, %p1105_p3 }
 0x323   :  { %1113 = shalt.err (!%p1110_p5)
}
 0x324   :  { %763 = dma.vmem_to_hbm [thread:$0]  %s761_s22, 512, %s1274_s8, [#allocation4]  }
 0x325   :  { %1120 = dma.done.wait [#allocation4], 512  }
 0x326   :  { %1121 = vsyncadd [#allocation4], 4294966784 }
 0x327   :  { %767 = vsyncpa [#allocation3], 1 }
 0x328   :  { %768 = vsyncpa [#allocation6], 1 }
 0x329   :  { %769 = vsyncpa [#allocation9], 1 }
 0x32a   :  { %770 = vsyncpa [#allocation4], 1 }

</bundles_post_ra>
